<compile_context>
chip_gen: v7x
topology: tpu7x:2x2x1
jax: 0.10.0
libtpu: 0.0.40
codegen_flags: <defaults>
</compile_context>

<pallas_src>
import functools

import numpy as np
import jax
import jax.numpy as jnp
from jax.experimental import pallas as pl
from jax.experimental.pallas import tpu as pltpu


# ----------------------------------------------------------------------------
# Pallas kernel
# ----------------------------------------------------------------------------
def _unet_block_kernel(x_ref, noise_ref, mask_ref,
                       g1_ref, gamma1_ref, beta1_ref, w1_ref, b1_ref,
                       wn_ref, bn_ref,
                       g2_ref, gamma2_ref, beta2_ref, w2_ref, b2_ref,
                       wr_ref, br_ref,
                       o_ref, *, img_w):
    HW = x_ref.shape[2]
    eps = 1e-5
    inv_hw = 1.0 / HW

    def group_norm_silu(v, g_ref, gamma_ref, beta_ref):
        # v: (C, HW) f32.  Per-channel spatial stats (lane reduce), then group
        # averaging via a (C, C) matmul; gamma*inv folded into one scale.
        s1 = jnp.sum(v, axis=1, keepdims=True) * inv_hw            # (C, 1)
        s2 = jnp.sum(v * v, axis=1, keepdims=True) * inv_hw        # (C, 1)
        mean_g = jnp.dot(g_ref[...], s1, preferred_element_type=jnp.float32)
        ex2_g = jnp.dot(g_ref[...], s2, preferred_element_type=jnp.float32)
        var = jnp.maximum(ex2_g - mean_g * mean_g, 0.0)
        scale = jax.lax.rsqrt(var + eps) * gamma_ref[...]           # (C, 1)
        shift = beta_ref[...] - mean_g * scale                      # (C, 1)
        a = v * scale + shift
        return a * jax.nn.sigmoid(a)                                # SiLU

    def conv3x3(a, w_ref, b_ref):
        # 'same' 3x3 conv: 9 lane-rolled taps (boundaries zeroed by host-built
        # masks) -> one (Cout, 9C) @ (9C, HW) bf16 matmul with f32 accumulate.
        taps = []
        for k in range(9):
            dy, dx = k // 3 - 1, k % 3 - 1
            s = dy * img_w + dx          # tap[p] = a[p + s] (zero at borders)
            if s == 0:
                taps.append(a)
            else:
                rolled = pltpu.roll(a, (-s) % HW, 1)   # lane-axis rotate (XLU)
                taps.append(rolled * mask_ref[k])      # (1, HW) boundary mask
        a9 = jnp.concatenate(taps, axis=0).astype(jnp.bfloat16)     # (9C, HW)
        return (jnp.dot(w_ref[...], a9, preferred_element_type=jnp.float32)
                + b_ref[...])                                       # (Cout, HW)

    x = x_ref[0].astype(jnp.float32)                                # (Cin, HW)

    # ---- input projection: GN -> SiLU -> Conv3x3 ----------------------------
    h = conv3x3(group_norm_silu(x, g1_ref, gamma1_ref, beta1_ref), w1_ref, b1_ref)
    # TODO(synk): Dropout2d treated as identity (eval mode); training mode
    # would need pltpu.prng_* based per-channel masking.

    # ---- noise level projection: SiLU -> 1x1 conv, broadcast over HW --------
    nl = noise_ref[0].astype(jnp.float32)                           # (Cn, 1)
    nl = nl * jax.nn.sigmoid(nl)
    h = h + (jnp.dot(wn_ref[...], nl, preferred_element_type=jnp.float32)
             + bn_ref[...])

    # ---- output projection: GN -> SiLU -> Conv3x3 ---------------------------
    out = conv3x3(group_norm_silu(h, g2_ref, gamma2_ref, beta2_ref),
                  w2_ref, b2_ref)

    # ---- residual 1x1 conv on x ---------------------------------------------
    out = out + jnp.dot(wr_ref[...], x.astype(jnp.bfloat16),
                        preferred_element_type=jnp.float32) + br_ref[...]

    o_ref[0] = out.astype(o_ref.dtype)                # lane-dense (Cout, HW) store


# ----------------------------------------------------------------------------
# Host-side helpers
# ----------------------------------------------------------------------------
def _group_avg_matrix(channels):
    groups = max(1, min(32, channels // 4))
    assert channels % groups == 0, "channels must be divisible by num_groups"
    cpg = channels // groups
    gid = np.arange(channels) // cpg
    m = (gid[:, None] == gid[None, :]).astype(np.float32) / float(cpg)
    return jnp.asarray(m)


def _boundary_masks(H, W):
    """(9, 1, H*W) 0/1 masks: validity of tap (dy, dx) at each spatial site."""
    yy, xx = np.meshgrid(np.arange(H), np.arange(W), indexing="ij")
    m = np.zeros((9, 1, H * W), np.float32)
    for k in range(9):
        dy, dx = k // 3 - 1, k % 3 - 1
        valid = ((yy + dy >= 0) & (yy + dy < H) &
                 (xx + dx >= 0) & (xx + dx < W))
        m[k, 0] = valid.reshape(-1).astype(np.float32)
    return jnp.asarray(m)


def unet_block_forward(x_nchw, noise_nchw, kp):
    """x_nchw: (N, Cin, H, W); noise_nchw: (N, Cn, 1, 1) -> (N, Cout, H, W)."""
    N, Cin, H, W = x_nchw.shape
    HW = H * W
    Cn = noise_nchw.shape[1]
    Cout = kp["b1"].shape[0]

    x_flat = x_nchw.reshape(N, Cin, HW).astype(jnp.float32)      # pure reshape
    noise_flat = noise_nchw.reshape(N, Cn, 1).astype(jnp.float32)
    masks = _boundary_masks(H, W)

    def full(arr):
        nd = arr.ndim
        return pl.BlockSpec(arr.shape, lambda n, _nd=nd: (0,) * _nd)

    in_specs = [
        pl.BlockSpec((1, Cin, HW), lambda n: (n, 0, 0)),
        pl.BlockSpec((1, Cn, 1), lambda n: (n, 0, 0)),
        full(masks),
        full(kp["g1"]), full(kp["gamma1"]), full(kp["beta1"]),
        full(kp["w1"]), full(kp["b1"]),
        full(kp["wn"]), full(kp["bn"]),
        full(kp["g2"]), full(kp["gamma2"]), full(kp["beta2"]),
        full(kp["w2"]), full(kp["b2"]),
        full(kp["wr"]), full(kp["br"]),
    ]

    out_flat = pl.pallas_call(
        functools.partial(_unet_block_kernel, img_w=W),
        out_shape=jax.ShapeDtypeStruct((N, Cout, HW), jnp.float32),
        grid_spec=pltpu.PrefetchScalarGridSpec(
            num_scalar_prefetch=0,
            grid=(N,),
            in_specs=in_specs,
            out_specs=pl.BlockSpec((1, Cout, HW), lambda n: (n, 0, 0)),
        ),
        compiler_params=pltpu.CompilerParams(
            dimension_semantics=("parallel",)),   # independent batch elements
    )(x_flat, noise_flat, masks,
      kp["g1"], kp["gamma1"], kp["beta1"], kp["w1"], kp["b1"],
      kp["wn"], kp["bn"],
      kp["g2"], kp["gamma2"], kp["beta2"], kp["w2"], kp["b2"],
      kp["wr"], kp["br"])

    return out_flat.reshape(N, Cout, H, W)


# ----------------------------------------------------------------------------
# Pure-JAX reference (mirrors the PyTorch module, NCHW) for verification
# ----------------------------------------------------------------------------
def _ref_forward(x, noise, rp):
    def gn(v, gamma, beta, groups):
        n, c, hh, ww = v.shape
        vg = v.reshape(n, groups, c // groups, hh, ww)
        mean = vg.mean(axis=(2, 3, 4), keepdims=True)
        var = vg.var(axis=(2, 3, 4), keepdims=True)
        vn = ((vg - mean) / jnp.sqrt(var + 1e-5)).reshape(n, c, hh, ww)
        return vn * gamma[None, :, None, None] + beta[None, :, None, None]

    silu = lambda v: v * jax.nn.sigmoid(v)
    dn = ("NCHW", "OIHW", "NCHW")

    def conv(v, w, b, pad):
        y = jax.lax.conv_general_dilated(v, w, (1, 1), pad, dimension_numbers=dn)
        return y + b[None, :, None, None]

    h = conv(silu(gn(x, rp["gamma1"], rp["beta1"], rp["g_in"])),
             rp["W1"], rp["b1"], "SAME")
    h = h + conv(silu(noise), rp["Wn"], rp["bn"], "VALID")
    out = conv(silu(gn(h, rp["gamma2"], rp["beta2"], rp["g_out"])),
               rp["W2"], rp["b2"], "SAME")
    return out + conv(x, rp["Wr"], rp["br"], "VALID")


# ----------------------------------------------------------------------------
if __name__ == "__main__":
    N, Cin, Cout, Cn, H, W = 2, 8, 8, 8, 16, 16
    g_in = min(32, Cin // 4)
    g_out = min(32, Cout // 4)

    key = jax.random.PRNGKey(0)
    ks = jax.random.split(key, 16)

    # Deterministic synthetic parameters (PyTorch-convention shapes).
    W1 = 0.2 * jax.random.normal(ks[0], (Cout, Cin, 3, 3), jnp.float32)
    b1 = 0.1 * jax.random.normal(ks[1], (Cout,), jnp.float32)
    Wn = 0.2 * jax.random.normal(ks[2], (Cout, Cn, 1, 1), jnp.float32)
    bn = 0.1 * jax.random.normal(ks[3], (Cout,), jnp.float32)
    W2 = 0.2 * jax.random.normal(ks[4], (Cout, Cout, 3, 3), jnp.float32)
    b2 = 0.1 * jax.random.normal(ks[5], (Cout,), jnp.float32)
    Wr = 0.2 * jax.random.normal(ks[6], (Cout, Cin, 1, 1), jnp.float32)
    br = 0.1 * jax.random.normal(ks[7], (Cout,), jnp.float32)
    gamma1 = 1.0 + 0.1 * jax.random.normal(ks[8], (Cin,), jnp.float32)
    beta1 = 0.1 * jax.random.normal(ks[9], (Cin,), jnp.float32)
    gamma2 = 1.0 + 0.1 * jax.random.normal(ks[10], (Cout,), jnp.float32)
    beta2 = 0.1 * jax.random.normal(ks[11], (Cout,), jnp.float32)

    # Inputs (PyTorch NCHW convention).
    x = jax.random.normal(ks[12], (N, Cin, H, W), jnp.float32)
    noise_level = jax.random.normal(ks[13], (N, Cn, 1, 1), jnp.float32)

    # Kernel-format parameters: per-channel vectors as (C, 1) columns, 3x3
    # weights flattened tap-major to (Cout, 9*C) in bf16, 1x1 convs as plain
    # channel matrices (weights for the big matmuls pre-cast to bf16 on host).
    kernel_params = {
        "g1": _group_avg_matrix(Cin),
        "gamma1": gamma1.reshape(Cin, 1),
        "beta1": beta1.reshape(Cin, 1),
        "w1": jnp.transpose(W1, (0, 2, 3, 1)).reshape(Cout, 9 * Cin)
                 .astype(jnp.bfloat16),
        "b1": b1.reshape(Cout, 1),
        "wn": Wn[:, :, 0, 0],                          # (Cout, Cn) f32 (tiny)
        "bn": bn.reshape(Cout, 1),
        "g2": _group_avg_matrix(Cout),
        "gamma2": gamma2.reshape(Cout, 1),
        "beta2": beta2.reshape(Cout, 1),
        "w2": jnp.transpose(W2, (0, 2, 3, 1)).reshape(Cout, 9 * Cout)
                 .astype(jnp.bfloat16),
        "b2": b2.reshape(Cout, 1),
        "wr": Wr[:, :, 0, 0].astype(jnp.bfloat16),     # (Cout, Cin) bf16
        "br": br.reshape(Cout, 1),
    }

    ref_params = {
        "W1": W1, "b1": b1, "Wn": Wn, "bn": bn, "W2": W2, "b2": b2,
        "Wr": Wr, "br": br, "gamma1": gamma1, "beta1": beta1,
        "gamma2": gamma2, "beta2": beta2, "g_in": g_in, "g_out": g_out,
    }

    out = unet_block_forward(x, noise_level, kernel_params)
    out = jax.block_until_ready(out)

    ref = jax.block_until_ready(_ref_forward(x, noise_level, ref_params))
    np.testing.assert_allclose(np.asarray(out), np.asarray(ref),
                               rtol=5e-2, atol=5e-2)

    print("KERNEL_OK")
</pallas_src>

<mosaic_0001>
module attributes {stable_mosaic.version = 11 : i64} {
  func.func @_unet_block_kernel(%arg0: i32, %arg1: memref<1x8x256xf32, #tpu.memory_space<vmem>>, %arg2: memref<1x8x1xf32, #tpu.memory_space<vmem>>, %arg3: memref<9x1x256xf32, #tpu.memory_space<vmem>>, %arg4: memref<8x8xf32, #tpu.memory_space<vmem>>, %arg5: memref<8x1xf32, #tpu.memory_space<vmem>>, %arg6: memref<8x1xf32, #tpu.memory_space<vmem>>, %arg7: memref<8x72xbf16, #tpu.memory_space<vmem>>, %arg8: memref<8x1xf32, #tpu.memory_space<vmem>>, %arg9: memref<8x8xf32, #tpu.memory_space<vmem>>, %arg10: memref<8x1xf32, #tpu.memory_space<vmem>>, %arg11: memref<8x8xf32, #tpu.memory_space<vmem>>, %arg12: memref<8x1xf32, #tpu.memory_space<vmem>>, %arg13: memref<8x1xf32, #tpu.memory_space<vmem>>, %arg14: memref<8x72xbf16, #tpu.memory_space<vmem>>, %arg15: memref<8x1xf32, #tpu.memory_space<vmem>>, %arg16: memref<8x8xbf16, #tpu.memory_space<vmem>>, %arg17: memref<8x1xf32, #tpu.memory_space<vmem>>, %arg18: memref<1x8x256xf32, #tpu.memory_space<vmem>>) attributes {dimension_semantics = [#tpu.dimension_semantics<parallel>], iteration_bounds = array<i64: 2>, scalar_prefetch = 0 : i64, scratch_operands = 0 : i64, tpu.core_type = #tpu.core_type<tc>, window_params = [{transform_indices = @transform_0, window_bounds = array<i64: 1, 8, 256>}, {transform_indices = @transform_1, window_bounds = array<i64: 1, 8, 1>}, {pipeline_mode = #tpu.pipeline_mode<synchronous>, transform_indices = @transform_2, window_bounds = array<i64: 9, 1, 256>}, {pipeline_mode = #tpu.pipeline_mode<synchronous>, transform_indices = @transform_3, window_bounds = array<i64: 8, 8>}, {pipeline_mode = #tpu.pipeline_mode<synchronous>, transform_indices = @transform_4, window_bounds = array<i64: 8, 1>}, {pipeline_mode = #tpu.pipeline_mode<synchronous>, transform_indices = @transform_5, window_bounds = array<i64: 8, 1>}, {pipeline_mode = #tpu.pipeline_mode<synchronous>, transform_indices = @transform_6, window_bounds = array<i64: 8, 72>}, {pipeline_mode = #tpu.pipeline_mode<synchronous>, transform_indices = @transform_7, window_bounds = array<i64: 8, 1>}, {pipeline_mode = #tpu.pipeline_mode<synchronous>, transform_indices = @transform_8, window_bounds = array<i64: 8, 8>}, {pipeline_mode = #tpu.pipeline_mode<synchronous>, transform_indices = @transform_9, window_bounds = array<i64: 8, 1>}, {pipeline_mode = #tpu.pipeline_mode<synchronous>, transform_indices = @transform_10, window_bounds = array<i64: 8, 8>}, {pipeline_mode = #tpu.pipeline_mode<synchronous>, transform_indices = @transform_11, window_bounds = array<i64: 8, 1>}, {pipeline_mode = #tpu.pipeline_mode<synchronous>, transform_indices = @transform_12, window_bounds = array<i64: 8, 1>}, {pipeline_mode = #tpu.pipeline_mode<synchronous>, transform_indices = @transform_13, window_bounds = array<i64: 8, 72>}, {pipeline_mode = #tpu.pipeline_mode<synchronous>, transform_indices = @transform_14, window_bounds = array<i64: 8, 1>}, {pipeline_mode = #tpu.pipeline_mode<synchronous>, transform_indices = @transform_15, window_bounds = array<i64: 8, 8>}, {pipeline_mode = #tpu.pipeline_mode<synchronous>, transform_indices = @transform_16, window_bounds = array<i64: 8, 1>}, {transform_indices = @transform_17, window_bounds = array<i64: 1, 8, 256>}]} {
    %c0 = arith.constant 0 : index
    %c0_0 = arith.constant 0 : index
    %c0_1 = arith.constant 0 : index
    %0 = vector.load %arg1[%c0, %c0_0, %c0_1] : memref<1x8x256xf32, #tpu.memory_space<vmem>>, vector<1x8x256xf32>
    %1 = vector.shape_cast %0 : vector<1x8x256xf32> to vector<8x256xf32>
    %cst = arith.constant dense<0.000000e+00> : vector<8xf32>
    %2 = vector.multi_reduction <add>, %1, %cst [1] : vector<8x256xf32> to vector<8xf32>
    %3 = vector.shape_cast %2 : vector<8xf32> to vector<8x1xf32>
    %cst_2 = arith.constant 3.906250e-03 : f32
    %4 = vector.broadcast %cst_2 : f32 to vector<8x1xf32>
    %5 = arith.mulf %3, %4 : vector<8x1xf32>
    %6 = arith.mulf %1, %1 : vector<8x256xf32>
    %cst_3 = arith.constant dense<0.000000e+00> : vector<8xf32>
    %7 = vector.multi_reduction <add>, %6, %cst_3 [1] : vector<8x256xf32> to vector<8xf32>
    %8 = vector.shape_cast %7 : vector<8xf32> to vector<8x1xf32>
    %cst_4 = arith.constant 3.906250e-03 : f32
    %9 = vector.broadcast %cst_4 : f32 to vector<8x1xf32>
    %10 = arith.mulf %8, %9 : vector<8x1xf32>
    %c0_5 = arith.constant 0 : index
    %c0_6 = arith.constant 0 : index
    %11 = vector.load %arg4[%c0_5, %c0_6] : memref<8x8xf32, #tpu.memory_space<vmem>>, vector<8x8xf32>
    %cst_7 = arith.constant dense<0.000000e+00> : vector<8x1xf32>
    %12 = tpu.matmul %11, %5, %cst_7 {dimension_numbers = #tpu.dot_dimension_numbers<[1], [0], [0], [1], [0, 0, 1, 1], [], []>} : vector<8x8xf32>, vector<8x1xf32>, vector<8x1xf32> -> vector<8x1xf32>
    %c0_8 = arith.constant 0 : index
    %c0_9 = arith.constant 0 : index
    %13 = vector.load %arg4[%c0_8, %c0_9] : memref<8x8xf32, #tpu.memory_space<vmem>>, vector<8x8xf32>
    %cst_10 = arith.constant dense<0.000000e+00> : vector<8x1xf32>
    %14 = tpu.matmul %13, %10, %cst_10 {dimension_numbers = #tpu.dot_dimension_numbers<[1], [0], [0], [1], [0, 0, 1, 1], [], []>} : vector<8x8xf32>, vector<8x1xf32>, vector<8x1xf32> -> vector<8x1xf32>
    %15 = arith.mulf %12, %12 : vector<8x1xf32>
    %16 = arith.subf %14, %15 : vector<8x1xf32>
    %cst_11 = arith.constant 0.000000e+00 : f32
    %17 = vector.broadcast %cst_11 : f32 to vector<8x1xf32>
    %18 = arith.maximumf %16, %17 : vector<8x1xf32>
    %cst_12 = arith.constant 9.99999974E-6 : f32
    %19 = vector.broadcast %cst_12 : f32 to vector<8x1xf32>
    %20 = arith.addf %18, %19 : vector<8x1xf32>
    %21 = math.rsqrt %20 : vector<8x1xf32>
    %c0_13 = arith.constant 0 : index
    %c0_14 = arith.constant 0 : index
    %22 = vector.load %arg5[%c0_13, %c0_14] : memref<8x1xf32, #tpu.memory_space<vmem>>, vector<8x1xf32>
    %23 = arith.mulf %21, %22 : vector<8x1xf32>
    %c0_15 = arith.constant 0 : index
    %c0_16 = arith.constant 0 : index
    %24 = vector.load %arg6[%c0_15, %c0_16] : memref<8x1xf32, #tpu.memory_space<vmem>>, vector<8x1xf32>
    %25 = arith.mulf %12, %23 : vector<8x1xf32>
    %26 = arith.subf %24, %25 : vector<8x1xf32>
    %27 = vector.broadcast %23 : vector<8x1xf32> to vector<8x256xf32>
    %28 = arith.mulf %1, %27 : vector<8x256xf32>
    %29 = vector.broadcast %26 : vector<8x1xf32> to vector<8x256xf32>
    %30 = arith.addf %28, %29 : vector<8x256xf32>
    %31 = arith.negf %30 : vector<8x256xf32>
    %32 = math.exp %31 : vector<8x256xf32>
    %cst_17 = arith.constant 1.000000e+00 : f32
    %33 = vector.broadcast %cst_17 : f32 to vector<8x256xf32>
    %34 = arith.addf %33, %32 : vector<8x256xf32>
    %35 = arith.divf %33, %34 : vector<8x256xf32>
    %36 = arith.mulf %30, %35 : vector<8x256xf32>
    %c17_i32 = arith.constant 17 : i32
    %37 = tpu.dynamic_rotate %36 by %c17_i32 dim 1 : vector<8x256xf32>, i32 -> vector<8x256xf32>
    %c0_18 = arith.constant 0 : index
    %c0_19 = arith.constant 0 : index
    %c0_20 = arith.constant 0 : index
    %38 = vector.load %arg3[%c0_18, %c0_19, %c0_20] : memref<9x1x256xf32, #tpu.memory_space<vmem>>, vector<1x1x256xf32>
    %39 = vector.shape_cast %38 : vector<1x1x256xf32> to vector<1x256xf32>
    %40 = vector.broadcast %39 : vector<1x256xf32> to vector<8x256xf32>
    %41 = arith.mulf %37, %40 : vector<8x256xf32>
    %c16_i32 = arith.constant 16 : i32
    %42 = tpu.dynamic_rotate %36 by %c16_i32 dim 1 : vector<8x256xf32>, i32 -> vector<8x256xf32>
    %c1 = arith.constant 1 : index
    %c0_21 = arith.constant 0 : index
    %c0_22 = arith.constant 0 : index
    %43 = vector.load %arg3[%c1, %c0_21, %c0_22] : memref<9x1x256xf32, #tpu.memory_space<vmem>>, vector<1x1x256xf32>
    %44 = vector.shape_cast %43 : vector<1x1x256xf32> to vector<1x256xf32>
    %45 = vector.broadcast %44 : vector<1x256xf32> to vector<8x256xf32>
    %46 = arith.mulf %42, %45 : vector<8x256xf32>
    %c15_i32 = arith.constant 15 : i32
    %47 = tpu.dynamic_rotate %36 by %c15_i32 dim 1 : vector<8x256xf32>, i32 -> vector<8x256xf32>
    %c2 = arith.constant 2 : index
    %c0_23 = arith.constant 0 : index
    %c0_24 = arith.constant 0 : index
    %48 = vector.load %arg3[%c2, %c0_23, %c0_24] : memref<9x1x256xf32, #tpu.memory_space<vmem>>, vector<1x1x256xf32>
    %49 = vector.shape_cast %48 : vector<1x1x256xf32> to vector<1x256xf32>
    %50 = vector.broadcast %49 : vector<1x256xf32> to vector<8x256xf32>
    %51 = arith.mulf %47, %50 : vector<8x256xf32>
    %c1_i32 = arith.constant 1 : i32
    %52 = tpu.dynamic_rotate %36 by %c1_i32 dim 1 : vector<8x256xf32>, i32 -> vector<8x256xf32>
    %c3 = arith.constant 3 : index
    %c0_25 = arith.constant 0 : index
    %c0_26 = arith.constant 0 : index
    %53 = vector.load %arg3[%c3, %c0_25, %c0_26] : memref<9x1x256xf32, #tpu.memory_space<vmem>>, vector<1x1x256xf32>
    %54 = vector.shape_cast %53 : vector<1x1x256xf32> to vector<1x256xf32>
    %55 = vector.broadcast %54 : vector<1x256xf32> to vector<8x256xf32>
    %56 = arith.mulf %52, %55 : vector<8x256xf32>
    %c255_i32 = arith.constant 255 : i32
    %57 = tpu.dynamic_rotate %36 by %c255_i32 dim 1 : vector<8x256xf32>, i32 -> vector<8x256xf32>
    %c5 = arith.constant 5 : index
    %c0_27 = arith.constant 0 : index
    %c0_28 = arith.constant 0 : index
    %58 = vector.load %arg3[%c5, %c0_27, %c0_28] : memref<9x1x256xf32, #tpu.memory_space<vmem>>, vector<1x1x256xf32>
    %59 = vector.shape_cast %58 : vector<1x1x256xf32> to vector<1x256xf32>
    %60 = vector.broadcast %59 : vector<1x256xf32> to vector<8x256xf32>
    %61 = arith.mulf %57, %60 : vector<8x256xf32>
    %c241_i32 = arith.constant 241 : i32
    %62 = tpu.dynamic_rotate %36 by %c241_i32 dim 1 : vector<8x256xf32>, i32 -> vector<8x256xf32>
    %c6 = arith.constant 6 : index
    %c0_29 = arith.constant 0 : index
    %c0_30 = arith.constant 0 : index
    %63 = vector.load %arg3[%c6, %c0_29, %c0_30] : memref<9x1x256xf32, #tpu.memory_space<vmem>>, vector<1x1x256xf32>
    %64 = vector.shape_cast %63 : vector<1x1x256xf32> to vector<1x256xf32>
    %65 = vector.broadcast %64 : vector<1x256xf32> to vector<8x256xf32>
    %66 = arith.mulf %62, %65 : vector<8x256xf32>
    %c240_i32 = arith.constant 240 : i32
    %67 = tpu.dynamic_rotate %36 by %c240_i32 dim 1 : vector<8x256xf32>, i32 -> vector<8x256xf32>
    %c7 = arith.constant 7 : index
    %c0_31 = arith.constant 0 : index
    %c0_32 = arith.constant 0 : index
    %68 = vector.load %arg3[%c7, %c0_31, %c0_32] : memref<9x1x256xf32, #tpu.memory_space<vmem>>, vector<1x1x256xf32>
    %69 = vector.shape_cast %68 : vector<1x1x256xf32> to vector<1x256xf32>
    %70 = vector.broadcast %69 : vector<1x256xf32> to vector<8x256xf32>
    %71 = arith.mulf %67, %70 : vector<8x256xf32>
    %c239_i32 = arith.constant 239 : i32
    %72 = tpu.dynamic_rotate %36 by %c239_i32 dim 1 : vector<8x256xf32>, i32 -> vector<8x256xf32>
    %c8 = arith.constant 8 : index
    %c0_33 = arith.constant 0 : index
    %c0_34 = arith.constant 0 : index
    %73 = vector.load %arg3[%c8, %c0_33, %c0_34] : memref<9x1x256xf32, #tpu.memory_space<vmem>>, vector<1x1x256xf32>
    %74 = vector.shape_cast %73 : vector<1x1x256xf32> to vector<1x256xf32>
    %75 = vector.broadcast %74 : vector<1x256xf32> to vector<8x256xf32>
    %76 = arith.mulf %72, %75 : vector<8x256xf32>
    %77 = tpu.concatenate %41, %46, %51, %56, %36, %61, %66, %71, %76 in 0 : vector<8x256xf32>, vector<8x256xf32>, vector<8x256xf32>, vector<8x256xf32>, vector<8x256xf32>, vector<8x256xf32>, vector<8x256xf32>, vector<8x256xf32>, vector<8x256xf32> -> vector<72x256xf32>
    %78 = arith.truncf %77 : vector<72x256xf32> to vector<72x256xbf16>
    %c0_35 = arith.constant 0 : index
    %c0_36 = arith.constant 0 : index
    %79 = vector.load %arg7[%c0_35, %c0_36] : memref<8x72xbf16, #tpu.memory_space<vmem>>, vector<8x72xbf16>
    %cst_37 = arith.constant dense<0.000000e+00> : vector<8x256xf32>
    %80 = tpu.matmul %79, %78, %cst_37 {dimension_numbers = #tpu.dot_dimension_numbers<[1], [0], [0], [1], [0, 0, 1, 1], [], []>} : vector<8x72xbf16>, vector<72x256xbf16>, vector<8x256xf32> -> vector<8x256xf32>
    %c0_38 = arith.constant 0 : index
    %c0_39 = arith.constant 0 : index
    %81 = vector.load %arg8[%c0_38, %c0_39] : memref<8x1xf32, #tpu.memory_space<vmem>>, vector<8x1xf32>
    %82 = vector.broadcast %81 : vector<8x1xf32> to vector<8x256xf32>
    %83 = arith.addf %80, %82 : vector<8x256xf32>
    %c0_40 = arith.constant 0 : index
    %c0_41 = arith.constant 0 : index
    %c0_42 = arith.constant 0 : index
    %84 = vector.load %arg2[%c0_40, %c0_41, %c0_42] : memref<1x8x1xf32, #tpu.memory_space<vmem>>, vector<1x8x1xf32>
    %85 = vector.shape_cast %84 : vector<1x8x1xf32> to vector<8x1xf32>
    %86 = arith.negf %85 : vector<8x1xf32>
    %87 = math.exp %86 : vector<8x1xf32>
    %cst_43 = arith.constant 1.000000e+00 : f32
    %88 = vector.broadcast %cst_43 : f32 to vector<8x1xf32>
    %89 = arith.addf %88, %87 : vector<8x1xf32>
    %90 = arith.divf %88, %89 : vector<8x1xf32>
    %91 = arith.mulf %85, %90 : vector<8x1xf32>
    %c0_44 = arith.constant 0 : index
    %c0_45 = arith.constant 0 : index
    %92 = vector.load %arg9[%c0_44, %c0_45] : memref<8x8xf32, #tpu.memory_space<vmem>>, vector<8x8xf32>
    %cst_46 = arith.constant dense<0.000000e+00> : vector<8x1xf32>
    %93 = tpu.matmul %92, %91, %cst_46 {dimension_numbers = #tpu.dot_dimension_numbers<[1], [0], [0], [1], [0, 0, 1, 1], [], []>} : vector<8x8xf32>, vector<8x1xf32>, vector<8x1xf32> -> vector<8x1xf32>
    %c0_47 = arith.constant 0 : index
    %c0_48 = arith.constant 0 : index
    %94 = vector.load %arg10[%c0_47, %c0_48] : memref<8x1xf32, #tpu.memory_space<vmem>>, vector<8x1xf32>
    %95 = arith.addf %93, %94 : vector<8x1xf32>
    %96 = vector.broadcast %95 : vector<8x1xf32> to vector<8x256xf32>
    %97 = arith.addf %83, %96 : vector<8x256xf32>
    %cst_49 = arith.constant dense<0.000000e+00> : vector<8xf32>
    %98 = vector.multi_reduction <add>, %97, %cst_49 [1] : vector<8x256xf32> to vector<8xf32>
    %99 = vector.shape_cast %98 : vector<8xf32> to vector<8x1xf32>
    %cst_50 = arith.constant 3.906250e-03 : f32
    %100 = vector.broadcast %cst_50 : f32 to vector<8x1xf32>
    %101 = arith.mulf %99, %100 : vector<8x1xf32>
    %102 = arith.mulf %97, %97 : vector<8x256xf32>
    %cst_51 = arith.constant dense<0.000000e+00> : vector<8xf32>
    %103 = vector.multi_reduction <add>, %102, %cst_51 [1] : vector<8x256xf32> to vector<8xf32>
    %104 = vector.shape_cast %103 : vector<8xf32> to vector<8x1xf32>
    %cst_52 = arith.constant 3.906250e-03 : f32
    %105 = vector.broadcast %cst_52 : f32 to vector<8x1xf32>
    %106 = arith.mulf %104, %105 : vector<8x1xf32>
    %c0_53 = arith.constant 0 : index
    %c0_54 = arith.constant 0 : index
    %107 = vector.load %arg11[%c0_53, %c0_54] : memref<8x8xf32, #tpu.memory_space<vmem>>, vector<8x8xf32>
    %cst_55 = arith.constant dense<0.000000e+00> : vector<8x1xf32>
    %108 = tpu.matmul %107, %101, %cst_55 {dimension_numbers = #tpu.dot_dimension_numbers<[1], [0], [0], [1], [0, 0, 1, 1], [], []>} : vector<8x8xf32>, vector<8x1xf32>, vector<8x1xf32> -> vector<8x1xf32>
    %c0_56 = arith.constant 0 : index
    %c0_57 = arith.constant 0 : index
    %109 = vector.load %arg11[%c0_56, %c0_57] : memref<8x8xf32, #tpu.memory_space<vmem>>, vector<8x8xf32>
    %cst_58 = arith.constant dense<0.000000e+00> : vector<8x1xf32>
    %110 = tpu.matmul %109, %106, %cst_58 {dimension_numbers = #tpu.dot_dimension_numbers<[1], [0], [0], [1], [0, 0, 1, 1], [], []>} : vector<8x8xf32>, vector<8x1xf32>, vector<8x1xf32> -> vector<8x1xf32>
    %111 = arith.mulf %108, %108 : vector<8x1xf32>
    %112 = arith.subf %110, %111 : vector<8x1xf32>
    %cst_59 = arith.constant 0.000000e+00 : f32
    %113 = vector.broadcast %cst_59 : f32 to vector<8x1xf32>
    %114 = arith.maximumf %112, %113 : vector<8x1xf32>
    %cst_60 = arith.constant 9.99999974E-6 : f32
    %115 = vector.broadcast %cst_60 : f32 to vector<8x1xf32>
    %116 = arith.addf %114, %115 : vector<8x1xf32>
    %117 = math.rsqrt %116 : vector<8x1xf32>
    %c0_61 = arith.constant 0 : index
    %c0_62 = arith.constant 0 : index
    %118 = vector.load %arg12[%c0_61, %c0_62] : memref<8x1xf32, #tpu.memory_space<vmem>>, vector<8x1xf32>
    %119 = arith.mulf %117, %118 : vector<8x1xf32>
    %c0_63 = arith.constant 0 : index
    %c0_64 = arith.constant 0 : index
    %120 = vector.load %arg13[%c0_63, %c0_64] : memref<8x1xf32, #tpu.memory_space<vmem>>, vector<8x1xf32>
    %121 = arith.mulf %108, %119 : vector<8x1xf32>
    %122 = arith.subf %120, %121 : vector<8x1xf32>
    %123 = vector.broadcast %119 : vector<8x1xf32> to vector<8x256xf32>
    %124 = arith.mulf %97, %123 : vector<8x256xf32>
    %125 = vector.broadcast %122 : vector<8x1xf32> to vector<8x256xf32>
    %126 = arith.addf %124, %125 : vector<8x256xf32>
    %127 = arith.negf %126 : vector<8x256xf32>
    %128 = math.exp %127 : vector<8x256xf32>
    %cst_65 = arith.constant 1.000000e+00 : f32
    %129 = vector.broadcast %cst_65 : f32 to vector<8x256xf32>
    %130 = arith.addf %129, %128 : vector<8x256xf32>
    %131 = arith.divf %129, %130 : vector<8x256xf32>
    %132 = arith.mulf %126, %131 : vector<8x256xf32>
    %c17_i32_66 = arith.constant 17 : i32
    %133 = tpu.dynamic_rotate %132 by %c17_i32_66 dim 1 : vector<8x256xf32>, i32 -> vector<8x256xf32>
    %c0_67 = arith.constant 0 : index
    %c0_68 = arith.constant 0 : index
    %c0_69 = arith.constant 0 : index
    %134 = vector.load %arg3[%c0_67, %c0_68, %c0_69] : memref<9x1x256xf32, #tpu.memory_space<vmem>>, vector<1x1x256xf32>
    %135 = vector.shape_cast %134 : vector<1x1x256xf32> to vector<1x256xf32>
    %136 = vector.broadcast %135 : vector<1x256xf32> to vector<8x256xf32>
    %137 = arith.mulf %133, %136 : vector<8x256xf32>
    %c16_i32_70 = arith.constant 16 : i32
    %138 = tpu.dynamic_rotate %132 by %c16_i32_70 dim 1 : vector<8x256xf32>, i32 -> vector<8x256xf32>
    %c1_71 = arith.constant 1 : index
    %c0_72 = arith.constant 0 : index
    %c0_73 = arith.constant 0 : index
    %139 = vector.load %arg3[%c1_71, %c0_72, %c0_73] : memref<9x1x256xf32, #tpu.memory_space<vmem>>, vector<1x1x256xf32>
    %140 = vector.shape_cast %139 : vector<1x1x256xf32> to vector<1x256xf32>
    %141 = vector.broadcast %140 : vector<1x256xf32> to vector<8x256xf32>
    %142 = arith.mulf %138, %141 : vector<8x256xf32>
    %c15_i32_74 = arith.constant 15 : i32
    %143 = tpu.dynamic_rotate %132 by %c15_i32_74 dim 1 : vector<8x256xf32>, i32 -> vector<8x256xf32>
    %c2_75 = arith.constant 2 : index
    %c0_76 = arith.constant 0 : index
    %c0_77 = arith.constant 0 : index
    %144 = vector.load %arg3[%c2_75, %c0_76, %c0_77] : memref<9x1x256xf32, #tpu.memory_space<vmem>>, vector<1x1x256xf32>
    %145 = vector.shape_cast %144 : vector<1x1x256xf32> to vector<1x256xf32>
    %146 = vector.broadcast %145 : vector<1x256xf32> to vector<8x256xf32>
    %147 = arith.mulf %143, %146 : vector<8x256xf32>
    %c1_i32_78 = arith.constant 1 : i32
    %148 = tpu.dynamic_rotate %132 by %c1_i32_78 dim 1 : vector<8x256xf32>, i32 -> vector<8x256xf32>
    %c3_79 = arith.constant 3 : index
    %c0_80 = arith.constant 0 : index
    %c0_81 = arith.constant 0 : index
    %149 = vector.load %arg3[%c3_79, %c0_80, %c0_81] : memref<9x1x256xf32, #tpu.memory_space<vmem>>, vector<1x1x256xf32>
    %150 = vector.shape_cast %149 : vector<1x1x256xf32> to vector<1x256xf32>
    %151 = vector.broadcast %150 : vector<1x256xf32> to vector<8x256xf32>
    %152 = arith.mulf %148, %151 : vector<8x256xf32>
    %c255_i32_82 = arith.constant 255 : i32
    %153 = tpu.dynamic_rotate %132 by %c255_i32_82 dim 1 : vector<8x256xf32>, i32 -> vector<8x256xf32>
    %c5_83 = arith.constant 5 : index
    %c0_84 = arith.constant 0 : index
    %c0_85 = arith.constant 0 : index
    %154 = vector.load %arg3[%c5_83, %c0_84, %c0_85] : memref<9x1x256xf32, #tpu.memory_space<vmem>>, vector<1x1x256xf32>
    %155 = vector.shape_cast %154 : vector<1x1x256xf32> to vector<1x256xf32>
    %156 = vector.broadcast %155 : vector<1x256xf32> to vector<8x256xf32>
    %157 = arith.mulf %153, %156 : vector<8x256xf32>
    %c241_i32_86 = arith.constant 241 : i32
    %158 = tpu.dynamic_rotate %132 by %c241_i32_86 dim 1 : vector<8x256xf32>, i32 -> vector<8x256xf32>
    %c6_87 = arith.constant 6 : index
    %c0_88 = arith.constant 0 : index
    %c0_89 = arith.constant 0 : index
    %159 = vector.load %arg3[%c6_87, %c0_88, %c0_89] : memref<9x1x256xf32, #tpu.memory_space<vmem>>, vector<1x1x256xf32>
    %160 = vector.shape_cast %159 : vector<1x1x256xf32> to vector<1x256xf32>
    %161 = vector.broadcast %160 : vector<1x256xf32> to vector<8x256xf32>
    %162 = arith.mulf %158, %161 : vector<8x256xf32>
    %c240_i32_90 = arith.constant 240 : i32
    %163 = tpu.dynamic_rotate %132 by %c240_i32_90 dim 1 : vector<8x256xf32>, i32 -> vector<8x256xf32>
    %c7_91 = arith.constant 7 : index
    %c0_92 = arith.constant 0 : index
    %c0_93 = arith.constant 0 : index
    %164 = vector.load %arg3[%c7_91, %c0_92, %c0_93] : memref<9x1x256xf32, #tpu.memory_space<vmem>>, vector<1x1x256xf32>
    %165 = vector.shape_cast %164 : vector<1x1x256xf32> to vector<1x256xf32>
    %166 = vector.broadcast %165 : vector<1x256xf32> to vector<8x256xf32>
    %167 = arith.mulf %163, %166 : vector<8x256xf32>
    %c239_i32_94 = arith.constant 239 : i32
    %168 = tpu.dynamic_rotate %132 by %c239_i32_94 dim 1 : vector<8x256xf32>, i32 -> vector<8x256xf32>
    %c8_95 = arith.constant 8 : index
    %c0_96 = arith.constant 0 : index
    %c0_97 = arith.constant 0 : index
    %169 = vector.load %arg3[%c8_95, %c0_96, %c0_97] : memref<9x1x256xf32, #tpu.memory_space<vmem>>, vector<1x1x256xf32>
    %170 = vector.shape_cast %169 : vector<1x1x256xf32> to vector<1x256xf32>
    %171 = vector.broadcast %170 : vector<1x256xf32> to vector<8x256xf32>
    %172 = arith.mulf %168, %171 : vector<8x256xf32>
    %173 = tpu.concatenate %137, %142, %147, %152, %132, %157, %162, %167, %172 in 0 : vector<8x256xf32>, vector<8x256xf32>, vector<8x256xf32>, vector<8x256xf32>, vector<8x256xf32>, vector<8x256xf32>, vector<8x256xf32>, vector<8x256xf32>, vector<8x256xf32> -> vector<72x256xf32>
    %174 = arith.truncf %173 : vector<72x256xf32> to vector<72x256xbf16>
    %c0_98 = arith.constant 0 : index
    %c0_99 = arith.constant 0 : index
    %175 = vector.load %arg14[%c0_98, %c0_99] : memref<8x72xbf16, #tpu.memory_space<vmem>>, vector<8x72xbf16>
    %cst_100 = arith.constant dense<0.000000e+00> : vector<8x256xf32>
    %176 = tpu.matmul %175, %174, %cst_100 {dimension_numbers = #tpu.dot_dimension_numbers<[1], [0], [0], [1], [0, 0, 1, 1], [], []>} : vector<8x72xbf16>, vector<72x256xbf16>, vector<8x256xf32> -> vector<8x256xf32>
    %c0_101 = arith.constant 0 : index
    %c0_102 = arith.constant 0 : index
    %177 = vector.load %arg15[%c0_101, %c0_102] : memref<8x1xf32, #tpu.memory_space<vmem>>, vector<8x1xf32>
    %178 = vector.broadcast %177 : vector<8x1xf32> to vector<8x256xf32>
    %179 = arith.addf %176, %178 : vector<8x256xf32>
    %c0_103 = arith.constant 0 : index
    %c0_104 = arith.constant 0 : index
    %180 = vector.load %arg16[%c0_103, %c0_104] : memref<8x8xbf16, #tpu.memory_space<vmem>>, vector<8x8xbf16>
    %181 = arith.truncf %1 : vector<8x256xf32> to vector<8x256xbf16>
    %cst_105 = arith.constant dense<0.000000e+00> : vector<8x256xf32>
    %182 = tpu.matmul %180, %181, %cst_105 {dimension_numbers = #tpu.dot_dimension_numbers<[1], [0], [0], [1], [0, 0, 1, 1], [], []>} : vector<8x8xbf16>, vector<8x256xbf16>, vector<8x256xf32> -> vector<8x256xf32>
    %183 = arith.addf %179, %182 : vector<8x256xf32>
    %c0_106 = arith.constant 0 : index
    %c0_107 = arith.constant 0 : index
    %184 = vector.load %arg17[%c0_106, %c0_107] : memref<8x1xf32, #tpu.memory_space<vmem>>, vector<8x1xf32>
    %185 = vector.broadcast %184 : vector<8x1xf32> to vector<8x256xf32>
    %186 = arith.addf %183, %185 : vector<8x256xf32>
    %c0_108 = arith.constant 0 : index
    %c0_109 = arith.constant 0 : index
    %c0_110 = arith.constant 0 : index
    %187 = vector.load %arg18[%c0_108, %c0_109, %c0_110] : memref<1x8x256xf32, #tpu.memory_space<vmem>>, vector<1x8x256xf32>
    %188 = vector.shape_cast %187 : vector<1x8x256xf32> to vector<8x256xf32>
    %189 = vector.shape_cast %186 : vector<8x256xf32> to vector<1x8x256xf32>
    tpu.vector_store %arg18[%c0_108, %c0_109, %c0_110], %189 {strides = array<i32>} : memref<1x8x256xf32, #tpu.memory_space<vmem>>, vector<1x8x256xf32>,
    return
  }
  func.func @transform_0(%arg0: i32) -> (i32, i32, i32) {
    %c0_i32 = arith.constant 0 : i32
    %c0_i32_0 = arith.constant 0 : i32
    %c0_i32_1 = arith.constant 0 : i32
    return %arg0, %c0_i32, %c0_i32_0 : i32, i32, i32
  }
  func.func @transform_1(%arg0: i32) -> (i32, i32, i32) {
    %c0_i32 = arith.constant 0 : i32
    %c0_i32_0 = arith.constant 0 : i32
    %c0_i32_1 = arith.constant 0 : i32
    return %arg0, %c0_i32, %c0_i32_0 : i32, i32, i32
  }
  func.func @transform_2(%arg0: i32) -> (i32, i32, i32) {
    %c0_i32 = arith.constant 0 : i32
    %c0_i32_0 = arith.constant 0 : i32
    %c0_i32_1 = arith.constant 0 : i32
    %c0_i32_2 = arith.constant 0 : i32
    return %c0_i32, %c0_i32_0, %c0_i32_1 : i32, i32, i32
  }
  func.func @transform_3(%arg0: i32) -> (i32, i32) {
    %c0_i32 = arith.constant 0 : i32
    %c0_i32_0 = arith.constant 0 : i32
    %c0_i32_1 = arith.constant 0 : i32
    return %c0_i32, %c0_i32_0 : i32, i32
  }
  func.func @transform_4(%arg0: i32) -> (i32, i32) {
    %c0_i32 = arith.constant 0 : i32
    %c0_i32_0 = arith.constant 0 : i32
    %c0_i32_1 = arith.constant 0 : i32
    return %c0_i32, %c0_i32_0 : i32, i32
  }
  func.func @transform_5(%arg0: i32) -> (i32, i32) {
    %c0_i32 = arith.constant 0 : i32
    %c0_i32_0 = arith.constant 0 : i32
    %c0_i32_1 = arith.constant 0 : i32
    return %c0_i32, %c0_i32_0 : i32, i32
  }
  func.func @transform_6(%arg0: i32) -> (i32, i32) {
    %c0_i32 = arith.constant 0 : i32
    %c0_i32_0 = arith.constant 0 : i32
    %c0_i32_1 = arith.constant 0 : i32
    return %c0_i32, %c0_i32_0 : i32, i32
  }
  func.func @transform_7(%arg0: i32) -> (i32, i32) {
    %c0_i32 = arith.constant 0 : i32
    %c0_i32_0 = arith.constant 0 : i32
    %c0_i32_1 = arith.constant 0 : i32
    return %c0_i32, %c0_i32_0 : i32, i32
  }
  func.func @transform_8(%arg0: i32) -> (i32, i32) {
    %c0_i32 = arith.constant 0 : i32
    %c0_i32_0 = arith.constant 0 : i32
    %c0_i32_1 = arith.constant 0 : i32
    return %c0_i32, %c0_i32_0 : i32, i32
  }
  func.func @transform_9(%arg0: i32) -> (i32, i32) {
    %c0_i32 = arith.constant 0 : i32
    %c0_i32_0 = arith.constant 0 : i32
    %c0_i32_1 = arith.constant 0 : i32
    return %c0_i32, %c0_i32_0 : i32, i32
  }
  func.func @transform_10(%arg0: i32) -> (i32, i32) {
    %c0_i32 = arith.constant 0 : i32
    %c0_i32_0 = arith.constant 0 : i32
    %c0_i32_1 = arith.constant 0 : i32
    return %c0_i32, %c0_i32_0 : i32, i32
  }
  func.func @transform_11(%arg0: i32) -> (i32, i32) {
    %c0_i32 = arith.constant 0 : i32
    %c0_i32_0 = arith.constant 0 : i32
    %c0_i32_1 = arith.constant 0 : i32
    return %c0_i32, %c0_i32_0 : i32, i32
  }
  func.func @transform_12(%arg0: i32) -> (i32, i32) {
    %c0_i32 = arith.constant 0 : i32
    %c0_i32_0 = arith.constant 0 : i32
    %c0_i32_1 = arith.constant 0 : i32
    return %c0_i32, %c0_i32_0 : i32, i32
  }
  func.func @transform_13(%arg0: i32) -> (i32, i32) {
    %c0_i32 = arith.constant 0 : i32
    %c0_i32_0 = arith.constant 0 : i32
    %c0_i32_1 = arith.constant 0 : i32
    return %c0_i32, %c0_i32_0 : i32, i32
  }
  func.func @transform_14(%arg0: i32) -> (i32, i32) {
    %c0_i32 = arith.constant 0 : i32
    %c0_i32_0 = arith.constant 0 : i32
    %c0_i32_1 = arith.constant 0 : i32
    return %c0_i32, %c0_i32_0 : i32, i32
  }
  func.func @transform_15(%arg0: i32) -> (i32, i32) {
    %c0_i32 = arith.constant 0 : i32
    %c0_i32_0 = arith.constant 0 : i32
    %c0_i32_1 = arith.constant 0 : i32
    return %c0_i32, %c0_i32_0 : i32, i32
  }
  func.func @transform_16(%arg0: i32) -> (i32, i32) {
    %c0_i32 = arith.constant 0 : i32
    %c0_i32_0 = arith.constant 0 : i32
    %c0_i32_1 = arith.constant 0 : i32
    return %c0_i32, %c0_i32_0 : i32, i32
  }
  func.func @transform_17(%arg0: i32) -> (i32, i32, i32) {
    %c0_i32 = arith.constant 0 : i32
    %c0_i32_0 = arith.constant 0 : i32
    %c0_i32_1 = arith.constant 0 : i32
    return %arg0, %c0_i32, %c0_i32_0 : i32, i32, i32
  }
}

</mosaic_0001>

<bundles_post_ra>
// kernel: tpu_custom_call.1
= control target key start
LH: loop header
LB: loop body
LE: loop exit
PB: predicated region body
PF: predicated region fallthrough
CT: control target
= control target key end

     0   :  { %s2342_s0 = inlined_call_operand.vmem [shape: f32[2,8,256], index: 0, kind: input, shape index: {}]   ;;  %s2343_s1 = inlined_call_operand.vmem [shape: f32[2,8,1], index: 1, kind: input, shape index: {}]   ;;  %s2344_s2 = inlined_call_operand.vmem [shape: f32[9,1,256], index: 2, kind: input, shape index: {}]   ;;  %s2345_s3 = inlined_call_operand.vmem [shape: f32[8,8], index: 3, kind: input, shape index: {}]   ;;  %s2346_s4 = inlined_call_operand.vmem [shape: f32[8,1], index: 4, kind: input, shape index: {}]   ;;  %s2347_s5 = inlined_call_operand.vmem [shape: f32[8,1], index: 5, kind: input, shape index: {}]   ;;  %s2348_s6 = inlined_call_operand.vmem [shape: bf16[8,72], index: 6, kind: input, shape index: {}]   ;;  %s2349_s7 = inlined_call_operand.vmem [shape: f32[8,1], index: 7, kind: input, shape index: {}]   ;;  %s2350_s8 = inlined_call_operand.vmem [shape: f32[8,8], index: 8, kind: input, shape index: {}]   ;;  %s2351_s9 = inlined_call_operand.vmem [shape: f32[8,1], index: 9, kind: input, shape index: {}]   ;;  %s2352_s10 = inlined_call_operand.vmem [shape: f32[8,8], index: 10, kind: input, shape index: {}]   ;;  %s2353_s11 = inlined_call_operand.vmem [shape: f32[8,1], index: 11, kind: input, shape index: {}]   ;;  %s2354_s12 = inlined_call_operand.vmem [shape: f32[8,1], index: 12, kind: input, shape index: {}]   ;;  %s2355_s13 = inlined_call_operand.vmem [shape: bf16[8,72], index: 13, kind: input, shape index: {}]   ;;  %s2356_s14 = inlined_call_operand.vmem [shape: f32[8,1], index: 14, kind: input, shape index: {}]   ;;  %s2357_s15 = inlined_call_operand.vmem [shape: bf16[8,8], index: 15, kind: input, shape index: {}]   ;;  %s2358_s16 = inlined_call_operand.vmem [shape: f32[8,1], index: 16, kind: input, shape index: {}]   ;;  %s2359_s17 = inlined_call_operand.hbm [shape: f32[2,8,256], index: 17, kind: output, shape index: {}]  }
   0x1   :  { %2371 = sst [smem:[#allocation8_spill]] %s2342_s0 }
   0x2   :  { %2372 = sst [smem:[#allocation9_spill]] %s2343_s1 }
   0x3   :  { %2373 = sst [smem:[#allocation10_spill]] %s2344_s2 }
   0x4   :  { %2374 = sst [smem:[#allocation11_spill]] %s2345_s3 }
   0x5   :  { %22 = vsyncpa [#allocation3], 0 }
   0x6   :  { %24 = vsyncpa [#allocation3 + $0x1], 0  ;;  %s1885_s24 = smov 0   ;;  %s1887_s25 = smov 0  }
   0x7   :  { %s1889_s26 = smov 0   ;;  %s1891_s27 = smov 0  }
   0x8 LB: > { %2375 = sst [smem:[#allocation5_spill]] %s1777_s26  ;;  %s1906_s28 = sadd.s32 4294967295, %s1781_s27   ;;  %s1781_s27 = sphi %s1891_s27, %s2388_s27   ;;  %s1777_s26 = sphi %s1889_s26, %s2390_s26   ;;  %s1773_s25 = sphi %s1887_s25, %s2392_s25   ;;  %s1769_s24 = sphi %s1885_s24, %s2391_s24  }
   0x9   : > { %s1570_s29 = sadd.s32 4294967294, %s1781_s27   ;;  %s1910_s0 = sadd.s32 1, %s1781_s27  }
   0xa   : > { %2376 = sst [smem:[#allocation6_spill]] %s1910_s0  ;;  %s404_s30 = sadd.s32 1, %s1777_s26 }
   0xb   : > { %s401_s18 = ssub.s32 %s1781_s27, %s1910_s0  ;;  %p414_p0 = scmp.ne.s32.totalorder %s1777_s26, %s1773_s25 }
   0xc   : > { %p402_p1 = scmp.eq.s32.totalorder %s401_s18, 0  ;;  %p415_p2 = scmp.eq.s32.totalorder %s1906_s28, 1 }
   0xd   : > { %p420_p3 = scmp.ne.s32.totalorder %s1773_s25, %s1769_s24  ;;  %p421_p4 = scmp.eq.s32.totalorder %s1570_s29, 1 }
   0xe   : > { %s1921_s19 = scalar_select %p402_p1, %s1777_s26, %s404_s30  }
   0xf   : > { %p1923_p5 = por %p415_p2, %p414_p0  ;;  %p1927_p6 = por %p421_p4, %p420_p3 }
  0x10   : > { %2377 = sst [smem:[#allocation7_spill]] %s1921_s19  ;;  %p1573_p7 = scmp.ge.s32.totalorder %s1781_s27, 1 }
  0x11   : > { %p499_p8 = scmp.lt.s32.totalorder %s1781_s27, 3 }
  0x13   : > { %p500_p9 = pnand %p1573_p7, %p499_p8 }
  0x14   : > { %p555_p10 = scmp.lt.s32.totalorder (!%p500_p9), %s1906_s28, 1  ;;  %s2380_s30 = sld [smem:[#allocation8_spill]] (!%p500_p9)  ;;  %v1783_v6 = vmov (!%p500_p9), 0.0   ;;  %vm1784_vm0 = vmmov (!%p500_p9), 0   ;;  %vm578_vm1 = vcmask (!%p500_p9), 64512   ;;  %v1785_v12 = vmov (!%p500_p9), 0  }
  0x15   : > { %503 = sbr.rel (%p500_p9) target bundleno = 1888 (0x760), region = 88  ;;  %1618 = vmatprep.subr.mxu0 (!%p500_p9), %v1783_v6  ;;  %1623 = vmatprep.subr.mxu1 (!%p500_p9), %v1783_v6  ;;  %s2381_s3 = sld [smem:[#allocation11_spill]] (!%p500_p9)  ;;  %v727_v21 = vld [vmem:[%s2346_s4] sm:$0xff] (!%p500_p9)  ;;  %v764_v51 = vlaneseq (!%p500_p9)  ;;  %vm958_vm10 = vcmask (!%p500_p9), 1043456   ;;  %vm954_vm11 = vcmask (!%p500_p9), 588800  }
  0x16   : > { %1620 = vmatprep.mubr.msk.f32.mxu0 (!%p500_p9), %vm1784_vm0, %v1783_v6  ;;  %1625 = vmatprep.mubr.msk.f32.mxu1 (!%p500_p9), %vm1784_vm0, %v1783_v6  ;;  %v729_v24 = vld [vmem:[%s2347_s5] sm:$0xff] (!%p500_p9)  ;;  %s2382_s26 = sld [smem:[#allocation9_spill]] (!%p500_p9)  ;;  %s1789_s19 = smov (!%p500_p9), 127  }
  0x17   : > { %1693 = vset.pattern.permute.xlu1 (!%p500_p9), %v1785_v12  ;;  %1694 = vset.pattern.permute.xlu0 (!%p500_p9), %v1785_v12  ;;  %v1014_v33 = vld [vmem:[%s2350_s8] sm:$0xff] (!%p500_p9)  ;;  %v772_v52 = vshrl.u32 (!%p500_p9), %v764_v51, 7  ;;  %v2029_v55 = vand.u32 (!%p500_p9), 127, %v764_v51  ;;  %s2383_s2 = sld [smem:[#allocation10_spill]] (!%p500_p9)  ;;  %s2386_s29 = smov (!%p500_p9), 113  }
  0x18   : > { %v948_v50 = vld [vmem:[%s2349_s7] sm:$0xff] (!%p500_p9) }
  0x19   : > { %v1015_v53 = vld [vmem:[%s2351_s9] sm:$0xff] (!%p500_p9)  ;;  %v2031_v56 = vsub.s32 (!%p500_p9), 0, %v772_v52  ;;  %v2036_v59 = vsub.s32 (!%p500_p9), 1, %v772_v52  ;;  %vm766_vm2 = vcmp.lt.s32.totalorder (!%p500_p9), %v2029_v55, 17  ;;  %vm787_vm3 = vcmp.lt.s32.totalorder (!%p500_p9), %v2029_v55, 16 }
  0x1a   : > { %vm809_vm4 = vcmp.lt.s32.totalorder (!%p500_p9), %v2029_v55, 15  ;;  %vm831_vm5 = vcmp.lt.s32.totalorder (!%p500_p9), %v2029_v55, 1  ;;  %vm853_vm6 = vcmp.lt.s32.totalorder (!%p500_p9), %v2029_v55, 127  ;;  %vm875_vm7 = vcmp.lt.s32.totalorder (!%p500_p9), %v2029_v55, 113 }
  0x1b   : > { %v577_v9 = vld [vmem:[%s2381_s3] sm:$0xff] (!%p500_p9)  ;;  %s1786_s3 = smov (!%p500_p9), 17   ;;  %vm897_vm8 = vcmp.lt.s32.totalorder (!%p500_p9), %v2029_v55, 112  ;;  %vm919_vm9 = vcmp.lt.s32.totalorder (!%p500_p9), %v2029_v55, 111 }
  0x1c   : > { %s1935_s21 = scalar_select %p555_p10, %s1906_s28, 1 }
  0x1d   : > { %v769_v58 = vld [vmem:[%s2383_s2] sm:$0x3]  ;;  %v1582_v62 = vld [vmem:[%s2383_s2 + $0x2] sm:$0x3]  ;;  %v1586_v52 = vld [vmem:[%s2383_s2 + $0xc] sm:$0x3] }
  0x1e   : > { %s1606_s22 = sshll.u32 %s1935_s21, 4  ;;  %s1577_s23 = sshll.u32 %s1935_s21, 3 }
  0x1f   : > { %s559_s18 = scalar_lea.vmem %s2380_s30, %s1606_s22  ;;  %s563_s0 = scalar_lea.vmem %s2382_s26, %s1577_s23 }
  0x20   : > { %v1941_v0 = vld [vmem:[%s559_s18] sm:$0xff]  ;;  %v1943_v1 = vld [vmem:[%s559_s18 + $0x8] sm:$0xff]  ;;  %s2363_s26 = smov 1   ;;  %s2369_s21 = smov 113  }
  0x21   : > { %v567_v2 = vadd.f32 %v1943_v1, %v1941_v0  ;;  %v571_v3 = vmul.f32 %v1941_v0, %v1941_v0  ;;  %v572_v4 = vmul.f32 %v1943_v1, %v1943_v1  ;;  %v1006_v27 = vld [vmem:[%s563_s0] sm:$0xff]  ;;  %s1788_s0 = smov 16   ;;  %s2365_s18 = smov 15  }
  0x22   : > { %v1591_v28 = vmul.f32 -1.442695, %v1006_v27  ;;  %s2367_s22 = smov 112   ;;  %s1793_s23 = smov 111  }
  0x23   : > { %568 = vadd.xlane.f32.xlu0 %v567_v2  ;;  %v573_v5 = vadd.f32 %v572_v4, %v571_v3  ;;  %v2043_v3 = vrot.slane %v769_v58, %v2031_v56  ;;  %v2046_v4 = vrot.slane %v769_v58, %v2036_v59  ;;  %s2387_s30 = smov 112  }
  0x27   : > { %574 = vadd.xlane.f32.xlu0 %v573_v5  ;;  %v2050_v5 = vrot.slane %v1582_v62, %v2031_v56 }
  0xb0   : > { %v569_v7 = vpop.xlane.xlu0 %568 }
  0xb1   : > { %v570_v8 = vmul.f32 0.00390625, %v569_v7  ;;  %v2053_v7 = vrot.slane %v1582_v62, %v2036_v59  ;;  %v2128_v62 = vrot.slane %v1586_v52, %v2036_v59 }
  0xb3   : > { %1619 = vmatpush3.msra.mxu0 %v570_v8 }
  0xb4   : > { %v575_v10 = vpop.xlane.xlu0 %574  ;;  %1621 = vmatmul.mubr.msk.f32.vlgmr.msra.gmra.mrb[0].mxu0 %vm578_vm1, %v577_v9 }
  0xb5   : > { %v576_v11 = vmul.f32 0.00390625, %v575_v10  ;;  %997 = vmatprep.mubr.bf16.mxu0 %v1785_v12 }
  0xb7   : > { %1624 = vmatpush3.msra.mxu1 %v576_v11 }
  0xb8   : > { %1626 = vmatmul.mubr.msk.f32.vlgmr.msra.gmra.mrb[0].mxu1 %vm578_vm1, %v577_v9  ;;  %1628 = vmatprep.subr.mxu1 %v1783_v6 }
  0xb9   : > { %1630 = vmatprep.mubr.msk.f32.mxu1 %vm1784_vm0, %v1783_v6 }
 0x187   : > { %v648_v13 = vpop.f32.mrb[0].mxu0 }
 0x188   : > { %v722_v14 = vmul.f32 %v648_v13, %v648_v13  ;;  %v1622_v15 = vpop.f32.mrb[1].mxu0 }
 0x18b   : > { %v718_v16 = vpop.f32.mrb[0].mxu1 }
 0x18c   : > { %v723_v17 = vsub.f32 %v718_v16, %v722_v14  ;;  %v1627_v18 = vpop.f32.mrb[1].mxu1 }
 0x18e   : > { %v724_v19 = vmax.f32 %v723_v17, 0.0 }
 0x190   : > { %v725_v20 = vadd.f32 1e-05, %v724_v19 }
 0x192   : > { %1695 = vrsqrt.f32 %v725_v20 }
 0x193   : > { %1697 = vpow2.f32 %v1591_v28 }
 0x19c   : > { %v1696_v22 = vpop.eup %1695 }
 0x19d   : > { %v728_v23 = vmul.f32 %v1696_v22, %v727_v21  ;;  %v1698_v29 = vpop.eup %1697  ;;  %v1583_v22 = vld [vmem:[%s2383_s2 + $0x4] sm:$0x3] }
 0x19e   : > { %v1010_v30 = vadd.f32 1.0, %v1698_v29 }
 0x19f   : > { %734 = vperm.xlu1 %1693, %v728_v23   ;;  %v730_v25 = vmul.f32 %v728_v23, %v648_v13  ;;  %v1584_v23 = vld [vmem:[%s2383_s2 + $0x6] sm:$0x3] }
 0x1a0   : > { %1699 = vrcp.f32 %v1010_v30  ;;  %v2082_v28 = vrot.slane %v1584_v23, %v2031_v56  ;;  %v2085_v29 = vrot.slane %v1584_v23, %v2036_v59  ;;  %v1585_v30 = vld [vmem:[%s2383_s2 + $0xa] sm:$0x3] }
 0x1a1   : > { %v731_v26 = vsub.f32 %v729_v24, %v730_v25  ;;  %v2075_v25 = vrot.slane %v1583_v22, %v2031_v56 }
 0x1a3   : > { %741 = vperm.xlu1 %1693, %v731_v26  }
 0x1aa   : > { %v1700_v31 = vpop.eup %1699 }
 0x1ab   : > { %v1013_v32 = vmul.f32 %v1700_v31, %v1006_v27  ;;  %v2078_v27 = vrot.slane %v1583_v22, %v2036_v59 }
 0x1ad   : > { %1629 = vmatpush3.msra.mxu1 %v1013_v32 }
 0x1ae   : > { %1631 = vmatmul.mubr.msk.f32.vlgmr.msra.gmra.mrb[2].mxu1 %vm578_vm1, %v1014_v33  ;;  %1633 = vmatprep.subr.mxu1 %v1783_v6 }
 0x1af   : > { %1635 = vmatprep.mubr.msk.f32.mxu1 %vm1784_vm0, %v1783_v6 }
 0x21e   : > { %v735_v34 = vpop.permute.xlu1 %734 }
 0x21f   : > { %v737_v35 = vmul.f32 %v735_v34, %v1941_v0  ;;  %v738_v36 = vmul.f32 %v735_v34, %v1943_v1 }
 0x222   : > { %v742_v37 = vpop.permute.xlu1 %741 }
 0x223   : > { %v744_v38 = vadd.f32 %v742_v37, %v737_v35  ;;  %v745_v39 = vadd.f32 %v742_v37, %v738_v36  ;;  %v2100_v36 = vrot.slane %v1585_v30, %v2031_v56  ;;  %v2103_v37 = vrot.slane %v1585_v30, %v2036_v59 }
 0x225   : > { %v1580_v40 = vmul.f32 -1.442695, %v744_v38  ;;  %v1581_v41 = vmul.f32 -1.442695, %v745_v39 }
 0x227   : > { %1701 = vpow2.f32 %v1580_v40 }
 0x228   : > { %1703 = vpow2.f32 %v1581_v41 }
 0x231   : > { %v1702_v42 = vpop.eup %1701 }
 0x232   : > { %v1704_v43 = vpop.eup %1703  ;;  %v752_v44 = vadd.f32 1.0, %v1702_v42 }
 0x233   : > { %v753_v45 = vadd.f32 1.0, %v1704_v43 }
 0x234   : > { %1705 = vrcp.f32 %v752_v44 }
 0x235   : > { %1707 = vrcp.f32 %v753_v45 }
 0x23e   : > { %v1706_v46 = vpop.eup %1705 }
 0x23f   : > { %v1708_v47 = vpop.eup %1707  ;;  %v1987_v48 = vmul.f32 %v1706_v46, %v744_v38 }
 0x240   : > { %v1989_v49 = vmul.f32 %v1708_v47, %v745_v39 }
 0x241   : > { %760 = vrot.lane.b32.xlu0 %v1987_v48, %s1786_s3 }
 0x242   : > { %762 = vrot.lane.b32.xlu1 %v1989_v49, %s1786_s3 }
 0x245   : > { %829 = vrot.lane.b32.xlu0 %v1989_v49, %s2363_s26 }
 0x246   : > { %783 = vrot.lane.b32.xlu1 %v1987_v48, %s1788_s0 }
 0x249   : > { %851 = vrot.lane.b32.xlu0 %v1989_v49, %s1789_s19 }
 0x24a   : > { %785 = vrot.lane.b32.xlu1 %v1989_v49, %s1788_s0 }
 0x24d   : > { %873 = vrot.lane.b32.xlu0 %v1989_v49, %s2369_s21 }
 0x24e   : > { %805 = vrot.lane.b32.xlu1 %v1987_v48, %s2365_s18 }
 0x251   : > { %895 = vrot.lane.b32.xlu0 %v1989_v49, %s2367_s22 }
 0x252   : > { %807 = vrot.lane.b32.xlu1 %v1989_v49, %s2365_s18  ;;  %s2384_s18 = smov 15  }
 0x255   : > { %917 = vrot.lane.b32.xlu0 %v1989_v49, %s1793_s23 }
 0x256   : > { %827 = vrot.lane.b32.xlu1 %v1987_v48, %s2363_s26 }
 0x25a   : > { %849 = vrot.lane.b32.xlu1 %v1987_v48, %s1789_s19 }
 0x25e   : > { %871 = vrot.lane.b32.xlu1 %v1987_v48, %s2369_s21 }
 0x262   : > { %893 = vrot.lane.b32.xlu1 %v1987_v48, %s2367_s22  ;;  %s2385_s22 = smov 1  }
 0x266   : > { %915 = vrot.lane.b32.xlu1 %v1987_v48, %s1793_s23 }
 0x26a   : > { %951 = vperm.xlu1 %1693, %v948_v50  }
 0x281   : > { %v1085_v57 = vpop.f32.mrb[2].mxu1 }
 0x282   : > { %v1086_v60 = vadd.f32 %v1085_v57, %v1015_v53  ;;  %v1632_v61 = vpop.f32.mrb[3].mxu1  ;;  %v1587_v53 = vld [vmem:[%s2383_s2 + $0xe] sm:$0x3] }
 0x284   : > { %1091 = vperm.xlu0 %1694, %v1086_v60   ;;  %v2125_v60 = vrot.slane %v1586_v52, %v2031_v56 }
 0x2b3   : > { %v761_v63 = vpop.permute.xlu0 %760 }
 0x2b4   : > { %v763_v54 = vpop.permute.xlu1 %762 }
 0x2b5   : > { %v767_v8 = vsel %vm766_vm2, %v761_v63, %v763_v54  ;;  %v768_v9 = vsel %vm766_vm2, %v763_v54, %v761_v63  ;;  %v2132_v63 = vrot.slane %v1587_v53, %v2031_v56 }
 0x2b6   : > { %v781_v14 = vmul.f32 %v2043_v3, %v768_v9  ;;  %v782_v15 = vmul.f32 %v2046_v4, %v767_v8 }
 0x2b7   : > { %v830_v18 = vpop.permute.xlu0 %829 }
 0x2b8   : > { %v784_v2 = vpop.permute.xlu1 %783 }
 0x2bb   : > { %v852_v26 = vpop.permute.xlu0 %851 }
 0x2bc   : > { %v786_v10 = vpop.permute.xlu1 %785 }
 0x2bd   : > { %v788_v11 = vsel %vm787_vm3, %v784_v2, %v786_v10  ;;  %v789_v13 = vsel %vm787_vm3, %v786_v10, %v784_v2 }
 0x2be   : > { %v803_v16 = vmul.f32 %v2050_v5, %v789_v13  ;;  %v804_v17 = vmul.f32 %v2053_v7, %v788_v11 }
 0x2bf   : > { %v874_v42 = vpop.permute.xlu0 %873 }
 0x2c0   : > { %v937_v19 = vpack.c.bf16 %v803_v16, %v781_v14  ;;  %v806_v20 = vpop.permute.xlu1 %805  ;;  %v938_v21 = vpack.c.bf16 %v804_v17, %v782_v15 }
 0x2c2   : > { %965 = vmatprep.subr.bf16.mxu0 %v938_v21 }
 0x2c3   : > { %966 = vmatpush1.bf16.msra.mxu0 %v937_v19  ;;  %v896_v61 = vpop.permute.xlu0 %895 }
 0x2c4   : > { %v808_v24 = vpop.permute.xlu1 %807 }
 0x2c5   : > { %v810_v31 = vsel %vm809_vm4, %v806_v20, %v808_v24  ;;  %v811_v32 = vsel %vm809_vm4, %v808_v24, %v806_v20 }
 0x2c6   : > { %v825_v38 = vmul.f32 %v2075_v25, %v811_v32  ;;  %v826_v39 = vmul.f32 %v2078_v27, %v810_v31  ;;  %v947_v32 = vld [vmem:[%s2348_s6] sm:$0xf] }
 0x2c7   : > { %v918_v19 = vpop.permute.xlu0 %917 }
 0x2c8   : > { %v828_v33 = vpop.permute.xlu1 %827 }
 0x2c9   : > { %v832_v34 = vsel %vm831_vm5, %v828_v33, %v830_v18  ;;  %v833_v35 = vsel %vm831_vm5, %v830_v18, %v828_v33 }
 0x2ca   : > { %v847_v40 = vmul.f32 %v2082_v28, %v833_v35  ;;  %v848_v41 = vmul.f32 %v2085_v29, %v832_v34 }
 0x2cc   : > { %v939_v43 = vpack.c.bf16 %v847_v40, %v825_v38  ;;  %v850_v44 = vpop.permute.xlu1 %849  ;;  %v940_v45 = vpack.c.bf16 %v848_v41, %v826_v39 }
 0x2cd   : > { %v854_v46 = vsel %vm853_vm6, %v850_v44, %v852_v26  ;;  %v855_v47 = vsel %vm853_vm6, %v852_v26, %v850_v44 }
 0x2ce   : > { %v869_v50 = vmul.f32 %v2100_v36, %v854_v46  ;;  %v870_v51 = vmul.f32 %v2103_v37, %v855_v47  ;;  %967 = vmatprep.subr.bf16.mxu0 %v940_v45 }
 0x2cf   : > { %968 = vmatpush1.bf16.msra.mxu0 %v939_v43 }
 0x2d0   : > { %v941_v54 = vpack.c.bf16 %v869_v50, %v1987_v48  ;;  %v872_v57 = vpop.permute.xlu1 %871  ;;  %v942_v58 = vpack.c.bf16 %v870_v51, %v1989_v49  ;;  %v2135_v48 = vrot.slane %v1587_v53, %v2036_v59  ;;  %v1588_v49 = vld [vmem:[%s2383_s2 + $0x10] sm:$0x3]  ;;  %v1106_v53 = vld [vmem:[%s2352_s10] sm:$0xff] }
 0x2d1   : > { %v876_v2 = vsel %vm875_vm7, %v872_v57, %v874_v42  ;;  %v877_v8 = vsel %vm875_vm7, %v874_v42, %v872_v57  ;;  %v2150_v13 = vrot.slane %v1588_v49, %v2031_v56  ;;  %v2153_v14 = vrot.slane %v1588_v49, %v2036_v59 }
 0x2d2   : > { %969 = vmatprep.subr.bf16.mxu0 %v942_v58  ;;  %v891_v15 = vmul.f32 %v2125_v60, %v876_v2  ;;  %v892_v16 = vmul.f32 %v2128_v62, %v877_v8 }
 0x2d3   : > { %970 = vmatpush1.bf16.msra.mxu0 %v941_v54 }
 0x2d4   : > { %v894_v9 = vpop.permute.xlu1 %893 }
 0x2d5   : > { %v898_v10 = vsel %vm897_vm8, %v894_v9, %v896_v61  ;;  %v899_v11 = vsel %vm897_vm8, %v896_v61, %v894_v9 }
 0x2d6   : > { %v913_v17 = vmul.f32 %v2132_v63, %v898_v10  ;;  %v914_v18 = vmul.f32 %v2135_v48, %v899_v11 }
 0x2d8   : > { %v943_v20 = vpack.c.bf16 %v913_v17, %v891_v15  ;;  %v916_v21 = vpop.permute.xlu1 %915  ;;  %v944_v22 = vpack.c.bf16 %v914_v18, %v892_v16  ;;  %v1255_v15 = vld [vmem:[%s2353_s11] sm:$0xff] }
 0x2d9   : > { %v920_v23 = vsel %vm919_vm9, %v916_v21, %v918_v19  ;;  %v921_v56 = vsel %vm919_vm9, %v918_v19, %v916_v21 }
 0x2da   : > { %v935_v59 = vmul.f32 %v2150_v13, %v920_v23  ;;  %v936_v24 = vmul.f32 %v2153_v14, %v921_v56  ;;  %971 = vmatprep.subr.bf16.mxu0 %v944_v22 }
 0x2db   : > { %972 = vmatpush1.bf16.msra.mxu0 %v943_v20 }
 0x2dc   : > { %v945_v26 = vpack.c.bf16 %v935_v59, %v935_v59  ;;  %v946_v30 = vpack.c.bf16 %v936_v24, %v936_v24 }
 0x2de   : > { %1589 = vmatprep.subr.msk.bf16.mxu0 %vm958_vm10, %v946_v30  ;;  %v960_v31 = vsel %vm958_vm10, %v945_v26, 0 }
 0x2df   : > { %974 = vmatpush1.bf16.msra.mxu0 %v960_v31 }
 0x2e2   : > { %1590 = vmatmul.mubr.msk.bf16.vlgmr.msra.gmra.mrb[4].mxu0 %vm954_vm11, %v947_v32 }
 0x2e3   : > { %1463 = vmatprep.mubr.bf16.mxu0 %v1785_v12 }
 0x2e9   : > { %v952_v33 = vpop.permute.xlu1 %951 }
 0x303   : > { %v1092_v35 = vpop.permute.xlu0 %1091 }
 0x3b5   : > { %v999_v34 = vpop.f32.mrb[4].mxu0 }
 0x3b6   : > { %v1000_v38 = vadd.f32 %v999_v34, %v952_v33  ;;  %v1001_v39 = vpop.f32.mrb[5].mxu0 }
 0x3b7   : > { %v1002_v40 = vadd.f32 %v1001_v39, %v952_v33  ;;  %v1003_v41 = vpop.f32.mrb[6].mxu0  ;;  %v1421_v39 = vpack.c.bf16 %v1943_v1, %v1943_v1  ;;  %v1419_v1 = vld [vmem:[%s2357_s15] sm:$0xf] }
 0x3b8   : > { %v1094_v42 = vadd.f32 %v1092_v35, %v1000_v38  ;;  %v1004_v43 = vpop.f32.mrb[7].mxu0 }
 0x3b9   : > { %v1095_v44 = vadd.f32 %v1092_v35, %v1002_v40  ;;  %v1420_v40 = vpack.c.bf16 %v1941_v0, %v1941_v0  ;;  %1599 = vmatprep.subr.msk.bf16.mxu0 %vm958_vm10, %v1421_v39  ;;  %v1474_v0 = vld [vmem:[%s2358_s16] sm:$0xff] }
 0x3ba   : > { %v1100_v45 = vmul.f32 %v1094_v42, %v1094_v42 }
 0x3bb   : > { %v1096_v46 = vadd.f32 %v1095_v44, %v1094_v42  ;;  %v1101_v47 = vmul.f32 %v1095_v44, %v1095_v44  ;;  %v1426_v41 = vsel %vm958_vm10, %v1420_v40, 0 }
 0x3bc   : > { %1432 = vmatpush1.bf16.msra.mxu0 %v1426_v41 }
 0x3bd   : > { %1097 = vadd.xlane.f32.xlu1 %v1096_v46  ;;  %v1102_v50 = vadd.f32 %v1101_v47, %v1100_v45 }
 0x3bf   : > { %1103 = vadd.xlane.f32.xlu0 %v1102_v50  ;;  %1600 = vmatmul.mubr.msk.bf16.vlgmr.msra.gmra.mrb[8].mxu0 %vm578_vm1, %v1419_v1  ;;  %v1362_v1 = vld [vmem:[%s2355_s13] sm:$0xf] }
 0x44a   : > { %v1098_v51 = vpop.xlane.xlu1 %1097 }
 0x44b   : > { %v1099_v52 = vmul.f32 0.00390625, %v1098_v51 }
 0x44c   : > { %v1104_v54 = vpop.xlane.xlu0 %1103 }
 0x44d   : > { %v1105_v57 = vmul.f32 0.00390625, %v1104_v54  ;;  %1634 = vmatpush3.msra.mxu1 %v1099_v52 }
 0x44e   : > { %1636 = vmatmul.mubr.msk.f32.vlgmr.msra.gmra.mrb[4].mxu1 %vm578_vm1, %v1106_v53  ;;  %1638 = vmatprep.subr.mxu1 %v1783_v6 }
 0x44f   : > { %1639 = vmatpush3.msra.mxu1 %v1105_v57  ;;  %1640 = vmatprep.mubr.msk.f32.mxu1 %vm1784_vm0, %v1783_v6  ;;  %v1257_v6 = vld [vmem:[%s2354_s12] sm:$0xff] }
 0x452   : > { %1641 = vmatmul.mubr.msk.f32.vlgmr.msra.gmra.mrb[6].mxu1 %vm578_vm1, %v1106_v53 }
 0x453   : > { %1410 = vmatprep.mubr.bf16.mxu1 %v1785_v12 }
 0x492   : > { %v1465_v55 = vpop.f32.mrb[8].mxu0 }
 0x521   : > { %v1176_v58 = vpop.f32.mrb[4].mxu1 }
 0x522   : > { %v1637_v61 = vpop.f32.mrb[5].mxu1  ;;  %v1250_v49 = vmul.f32 %v1176_v58, %v1176_v58 }
 0x525   : > { %v1246_v2 = vpop.f32.mrb[6].mxu1 }
 0x526   : > { %v1251_v8 = vsub.f32 %v1246_v2, %v1250_v49  ;;  %v1642_v9 = vpop.f32.mrb[7].mxu1 }
 0x528   : > { %v1252_v10 = vmax.f32 %v1251_v8, 0.0 }
 0x52a   : > { %v1253_v11 = vadd.f32 1e-05, %v1252_v10 }
 0x52c   : > { %1709 = vrsqrt.f32 %v1253_v11 }
 0x536   : > { %v1710_v16 = vpop.eup %1709 }
 0x537   : > { %v1256_v17 = vmul.f32 %v1710_v16, %v1255_v15 }
 0x539   : > { %1262 = vperm.xlu1 %1693, %v1256_v17   ;;  %v1258_v12 = vmul.f32 %v1256_v17, %v1176_v58 }
 0x53b   : > { %v1259_v18 = vsub.f32 %v1257_v6, %v1258_v12 }
 0x53d   : > { %1269 = vperm.xlu0 %1694, %v1259_v18  }
 0x5b8   : > { %v1263_v19 = vpop.permute.xlu1 %1262 }
 0x5b9   : > { %v1265_v20 = vmul.f32 %v1263_v19, %v1094_v42  ;;  %v1266_v21 = vmul.f32 %v1263_v19, %v1095_v44  ;;  %v1363_v42 = vld [vmem:[%s2356_s14] sm:$0xff] }
 0x5bc   : > { %v1270_v22 = vpop.permute.xlu0 %1269 }
 0x5bd   : > { %v1272_v23 = vadd.f32 %v1270_v22, %v1265_v20  ;;  %v1273_v56 = vadd.f32 %v1270_v22, %v1266_v21 }
 0x5bf   : > { %v1595_v59 = vmul.f32 -1.442695, %v1272_v23  ;;  %v1596_v24 = vmul.f32 -1.442695, %v1273_v56 }
 0x5c1   : > { %1711 = vpow2.f32 %v1595_v59 }
 0x5c2   : > { %1713 = vpow2.f32 %v1596_v24 }
 0x5cb   : > { %v1712_v26 = vpop.eup %1711 }
 0x5cc   : > { %v1714_v30 = vpop.eup %1713  ;;  %v1280_v31 = vadd.f32 1.0, %v1712_v26 }
 0x5cd   : > { %v1281_v32 = vadd.f32 1.0, %v1714_v30 }
 0x5ce   : > { %1715 = vrcp.f32 %v1280_v31 }
 0x5cf   : > { %1717 = vrcp.f32 %v1281_v32 }
 0x5d8   : > { %v1716_v33 = vpop.eup %1715 }
 0x5d9   : > { %v2187_v34 = vmul.f32 %v1716_v33, %v1272_v23  ;;  %v1718_v35 = vpop.eup %1717 }
 0x5da   : > { %v2193_v38 = vmul.f32 %v1718_v35, %v1273_v56 }
 0x5db   : > { %1296 = vrot.lane.b32.xlu0 %v2187_v34, %s1788_s0  ;;  %1288 = vrot.lane.b32.xlu1 %v2187_v34, %s1786_s3 }
 0x5df   : > { %1304 = vrot.lane.b32.xlu0 %v2187_v34, %s2384_s18  ;;  %1290 = vrot.lane.b32.xlu1 %v2193_v38, %s1786_s3  ;;  %s1607_s3 = sshll.u32 %s1906_s28, 8 }
 0x5e3   : > { %1312 = vrot.lane.b32.xlu0 %v2187_v34, %s2385_s22  ;;  %1298 = vrot.lane.b32.xlu1 %v2193_v38, %s1788_s0 }
 0x5e7   : > { %1320 = vrot.lane.b32.xlu0 %v2187_v34, %s1789_s19  ;;  %1306 = vrot.lane.b32.xlu1 %v2193_v38, %s2384_s18  ;;  %s2300_s18 = scalar_lea.hbm %s2359_s17, %s1607_s3 }
 0x5eb   : > { %1328 = vrot.lane.b32.xlu0 %v2187_v34, %s2386_s29  ;;  %1314 = vrot.lane.b32.xlu1 %v2193_v38, %s2385_s22  ;;  %s1794_s22 = smov [#allocation2]  }
 0x5ef   : > { %1336 = vrot.lane.b32.xlu0 %v2187_v34, %s2387_s30  ;;  %1322 = vrot.lane.b32.xlu1 %v2193_v38, %s1789_s19 }
 0x5f3   : > { %1344 = vrot.lane.b32.xlu0 %v2187_v34, %s1793_s23  ;;  %1330 = vrot.lane.b32.xlu1 %v2193_v38, %s2386_s29  ;;  %s552_s29 = sand.u32 1, %s1773_s25  }
 0x5f7   : > { %1366 = vperm.xlu0 %1694, %v1363_v42   ;;  %1338 = vrot.lane.b32.xlu1 %v2193_v38, %s2387_s30  ;;  %s1574_s30 = sshll.u32 %s552_s29, 4 }
 0x5f8   : > { %s554_s0 = scalar_lea.vmem [#allocation2], %s1574_s30  ;;  %s1723_s30 = sshll.u32 %s1794_s22, 4  ;;  %s1724_s30 = int_to_ptr.vmem [resolvable:$false] %s1723_s30 }
 0x5f9   : > { %s1499_s19 = sshll.u32 %s554_s0, 4  ;;  %s1725_s2 = scalar_lea.vmem %s1724_s30, 512  ;;  %s2302_s19 = int_to_ptr.vmem [resolvable:$true] %s1499_s19 }
 0x5fa   : > { %s1719_s28 = scalar_lea.vmem %s2302_s19, 256  ;;  %p1726_p0 = scmp.lt.s32.totalorder %s2302_s19, %s1724_s30 }
 0x5fb   : > { %1346 = vrot.lane.b32.xlu1 %v2193_v38, %s1793_s23  ;;  %s1485_s23 = scalar_lea.sflag [#allocation3], %s552_s29  ;;  %p1720_p11 = scmp.ne.s32.totalorder %s2302_s19, %s1719_s28 }
 0x5fc   : > { %p1727_p1 = scmp.lt.s32.totalorder %s1725_s2, %s1719_s28 }
 0x5fd   : > { %p1721_p12 = pnand %p1720_p11, %p1923_p5 }
 0x5fe   : > { %p1728_p2 = por %p1727_p1, %p1726_p0 }
 0x5ff   : > { %1477 = vperm.xlu1 %1693, %v1474_v0   ;;  %p1722_p13 = pneg %p1721_p12 }
 0x601   : > { %p1729_p3 = pnand %p1728_p2, %p1722_p13 }
 0x64d   : > { %v1297_v43 = vpop.permute.xlu0 %1296  ;;  %v1289_v44 = vpop.permute.xlu1 %1288 }
 0x651   : > { %v1305_v45 = vpop.permute.xlu0 %1304  ;;  %v1291_v46 = vpop.permute.xlu1 %1290 }
 0x652   : > { %v1292_v47 = vsel %vm766_vm2, %v1289_v44, %v1291_v46  ;;  %v1293_v50 = vsel %vm766_vm2, %v1291_v46, %v1289_v44 }
 0x653   : > { %v1294_v57 = vmul.f32 %v1293_v50, %v2043_v3  ;;  %v1295_v58 = vmul.f32 %v1292_v47, %v2046_v4 }
 0x655   : > { %v1313_v51 = vpop.permute.xlu0 %1312  ;;  %v1299_v52 = vpop.permute.xlu1 %1298 }
 0x656   : > { %v1300_v53 = vsel %vm787_vm3, %v1297_v43, %v1299_v52  ;;  %v1301_v54 = vsel %vm787_vm3, %v1299_v52, %v1297_v43 }
 0x657   : > { %v1302_v61 = vmul.f32 %v1301_v54, %v2050_v5  ;;  %v1303_v49 = vmul.f32 %v1300_v53, %v2053_v7 }
 0x659   : > { %v1352_v2 = vpack.c.bf16 %v1302_v61, %v1294_v57  ;;  %v1307_v8 = vpop.permute.xlu1 %1306  ;;  %v1353_v9 = vpack.c.bf16 %v1303_v49, %v1295_v58  ;;  %v1321_v10 = vpop.permute.xlu0 %1320 }
 0x65a   : > { %v1308_v11 = vsel %vm809_vm4, %v1305_v45, %v1307_v8  ;;  %v1309_v15 = vsel %vm809_vm4, %v1307_v8, %v1305_v45 }
 0x65b   : > { %1378 = vmatprep.subr.bf16.mxu1 %v1353_v9  ;;  %v1310_v5 = vmul.f32 %v1309_v15, %v2075_v25  ;;  %v1311_v7 = vmul.f32 %v1308_v11, %v2078_v27 }
 0x65c   : > { %1379 = vmatpush1.bf16.msra.mxu1 %v1352_v2 }
 0x65d   : > { %v1315_v16 = vpop.permute.xlu1 %1314  ;;  %v1329_v12 = vpop.permute.xlu0 %1328 }
 0x65e   : > { %v1316_v3 = vsel %vm831_vm5, %v1313_v51, %v1315_v16  ;;  %v1317_v4 = vsel %vm831_vm5, %v1315_v16, %v1313_v51 }
 0x65f   : > { %v1318_v17 = vmul.f32 %v1317_v4, %v2082_v28  ;;  %v1319_v6 = vmul.f32 %v1316_v3, %v2085_v29 }
 0x661   : > { %v1354_v18 = vpack.c.bf16 %v1318_v17, %v1310_v5  ;;  %v1323_v19 = vpop.permute.xlu1 %1322  ;;  %v1355_v20 = vpack.c.bf16 %v1319_v6, %v1311_v7  ;;  %v1337_v56 = vpop.permute.xlu0 %1336 }
 0x662   : > { %v1324_v21 = vsel %vm853_vm6, %v1321_v10, %v1323_v19  ;;  %v1325_v22 = vsel %vm853_vm6, %v1323_v19, %v1321_v10 }
 0x663   : > { %v1326_v23 = vmul.f32 %v1324_v21, %v2100_v36  ;;  %v1327_v25 = vmul.f32 %v1325_v22, %v2103_v37  ;;  %1380 = vmatprep.subr.bf16.mxu1 %v1355_v20 }
 0x664   : > { %1381 = vmatpush1.bf16.msra.mxu1 %v1354_v18 }
 0x665   : > { %v1356_v27 = vpack.c.bf16 %v1326_v23, %v2187_v34  ;;  %v1331_v28 = vpop.permute.xlu1 %1330  ;;  %v1357_v29 = vpack.c.bf16 %v1327_v25, %v2193_v38  ;;  %v1345_v34 = vpop.permute.xlu0 %1344 }
 0x666   : > { %v1332_v59 = vsel %vm875_vm7, %v1329_v12, %v1331_v28  ;;  %v1333_v24 = vsel %vm875_vm7, %v1331_v28, %v1329_v12 }
 0x667   : > { %1382 = vmatprep.subr.bf16.mxu1 %v1357_v29  ;;  %v1334_v30 = vmul.f32 %v1332_v59, %v2125_v60  ;;  %v1335_v31 = vmul.f32 %v1333_v24, %v2128_v62 }
 0x668   : > { %1383 = vmatpush1.bf16.msra.mxu1 %v1356_v27 }
 0x669   : > { %v1339_v26 = vpop.permute.xlu1 %1338 }
 0x66a   : > { %v1340_v36 = vsel %vm897_vm8, %v1337_v56, %v1339_v26  ;;  %v1341_v37 = vsel %vm897_vm8, %v1339_v26, %v1337_v56 }
 0x66b   : > { %v1342_v32 = vmul.f32 %v1340_v36, %v2132_v63  ;;  %v1343_v33 = vmul.f32 %v1341_v37, %v2135_v48 }
 0x66d   : > { %v1358_v35 = vpack.c.bf16 %v1342_v32, %v1334_v30  ;;  %v1347_v38 = vpop.permute.xlu1 %1346  ;;  %v1359_v39 = vpack.c.bf16 %v1343_v33, %v1335_v31 }
 0x66e   : > { %v1348_v40 = vsel %vm919_vm9, %v1345_v34, %v1347_v38  ;;  %v1349_v41 = vsel %vm919_vm9, %v1347_v38, %v1345_v34 }
 0x66f   : > { %v1350_v42 = vmul.f32 %v1348_v40, %v2150_v13  ;;  %v1351_v60 = vmul.f32 %v1349_v41, %v2153_v14  ;;  %1384 = vmatprep.subr.bf16.mxu1 %v1359_v39  ;;  %v1467_v13 = vpop.f32.mrb[9].mxu0 }
 0x670   : > { %1385 = vmatpush1.bf16.msra.mxu1 %v1358_v35  ;;  %v1469_v0 = vpop.f32.mrb[10].mxu0 }
 0x671   : > { %v1360_v62 = vpack.c.bf16 %v1350_v42, %v1350_v42  ;;  %v1361_v63 = vpack.c.bf16 %v1351_v60, %v1351_v60  ;;  %v1470_v14 = vpop.f32.mrb[11].mxu0 }
 0x673   : > { %1597 = vmatprep.subr.msk.bf16.mxu1 %vm958_vm10, %v1361_v63  ;;  %v1373_v48 = vsel %vm958_vm10, %v1360_v62, 0 }
 0x674   : > { %1387 = vmatpush1.bf16.msra.mxu1 %v1373_v48 }
 0x676   : > { %v1367_v43 = vpop.permute.xlu0 %1366 }
 0x677   : > { %1598 = vmatmul.mubr.msk.bf16.vlgmr.msra.gmra.mrb[8].mxu1 %vm954_vm11, %v1362_v1 }
 0x67e   : > { %v1478_v53 = vpop.permute.xlu1 %1477 }
 0x74a   : > { %v1412_v44 = vpop.f32.mrb[8].mxu1 }
 0x74b   : > { %v1413_v45 = vadd.f32 %v1412_v44, %v1367_v43  ;;  %v1414_v46 = vpop.f32.mrb[9].mxu1 }
 0x74c   : > { %v1415_v47 = vadd.f32 %v1414_v46, %v1367_v43  ;;  %v1416_v50 = vpop.f32.mrb[10].mxu1 }
 0x74d   : > { %v1472_v51 = vadd.f32 %v1465_v55, %v1413_v45  ;;  %v1417_v52 = vpop.f32.mrb[11].mxu1 }
 0x74e   : > { %v1473_v54 = vadd.f32 %v1467_v13, %v1415_v47 }
 0x74f   : > { %v1480_v57 = vadd.f32 %v1478_v53, %v1472_v51 }
 0x750   : > { %v1481_v58 = vadd.f32 %v1478_v53, %v1473_v54 }
 0x751   : > { %1482 = vst [vmem:[%s554_s0] sm:$0xff] %v1480_v57 }
 0x752   : > { %1483 = vst [vmem:[%s554_s0 + $0x8] sm:$0xff] %v1481_v58 }
 0x753   : > { %1732 = shalt.err (!%p1729_p3)
}
 0x754   : > { %s1733_s29 = scalar_lea.hbm %s2300_s18, 256  ;;  %s1737_s26 = scalar_lea.hbm %s2359_s17, 512 }
 0x755   : > { %p1734_p4 = scmp.ne.s32.totalorder %s2300_s18, %s1733_s29  ;;  %p1738_p9 = scmp.lt.u32.totalorder %s2300_s18, %s2359_s17 }
 0x756   : > { %p1739_p10 = scmp.lt.u32.totalorder %s1737_s26, %s1733_s29  ;;  %p1741_p12 = scmp.lt.u32.totalorder %s1733_s29, %s2300_s18 }
 0x757   : > { %p1735_p7 = pnand %p1734_p4, %p1923_p5 }
 0x758   : > { %p1740_p11 = por %p1739_p10, %p1738_p9 }
 0x759   : > { %p1736_p8 = pneg %p1735_p7 }
 0x75a   : > { %p1742_p13 = por %p1741_p12, %p1740_p11 }
 0x75c   : > { %p1743_p0 = pnand %p1742_p13, %p1736_p8 }
 0x75e   : > { %1746 = shalt.err (!%p1743_p0)
}
 0x75f   : > { %1643 = dma.vmem_to_hbm [thread:$0]  (%p1923_p5), %s2302_s19, 256, %s2300_s18, %s1485_s23  }
 0x760 PF: > { %p1649_p1 = scmp.ge.s32.totalorder %s1781_s27, 2  ;;  %s1511_s2 = sand.u32 1, %s1769_s24  }
 0x761   : > { %s1512_s28 = scalar_lea.sflag [#allocation3], %s1511_s2 }
 0x762   : > { %p1646_p2 = pnand %p1649_p1, %p1927_p6 }
 0x764   : > { %1764 = dma.done.wait (!%p1646_p2), %s1512_s28, 256  }
 0x765   : > { %1766 = vsyncadd (!%p1646_p2), %s1512_s28, 4294967040  ;;  %s2388_s27 = sld [smem:[#allocation6_spill]]  ;;  %s2389_s30 = sld [smem:[#allocation5_spill]] }
 0x766   : > { %s2390_s26 = sld [smem:[#allocation7_spill]]  ;;  %s2391_s24 = smov %s1773_s25 }
 0x76b   : > { %p27_p3 = scmp.ge.s32.totalorder %s2388_s27, 4   ;;  %s2392_s25 = smov %s2389_s30 }
 0x76d   :  { %29 = sbr.rel (!%p27_p3) target bundleno = 8 (0x8), region = 133 }
 0x774   :  { %1517 = vsyncpa [#allocation3], 1 }
 0x775   :  { %1519 = vsyncpa [#allocation3 + $0x1], 1 }

</bundles_post_ra>
